<compile_context>
chip_gen: v7x
topology: tpu7x:2x2x1
jax: 0.10.0
libtpu: 0.0.40
codegen_flags: <defaults>
</compile_context>

<pallas_src>
import jax
import jax.numpy as jnp
from jax.experimental import pallas as pl
from jax.experimental.pallas import tpu as pltpu


def _round_up(x, m):
    return (x + m - 1) // m * m


def _lstm_cell(xh, c, w_gates, b_gates):
    """One fused LSTM cell step.  xh:(B,I+H)  c:(B,H)  w_gates:(I+H,4H)  b_gates:(B or 1,4H)."""
    H = c.shape[-1]
    gates = jnp.dot(xh, w_gates, preferred_element_type=jnp.float32) + b_gates  # (B, 4H)
    # Full-vreg nonlinearities: 4H == 128 lanes -> two EUP passes, no per-slice relayouts.
    sig = jax.nn.sigmoid(gates)
    tnh = jnp.tanh(gates)
    i_g = sig[:, 0 * H:1 * H]
    f_g = sig[:, 1 * H:2 * H]
    g_g = tnh[:, 2 * H:3 * H]
    o_g = sig[:, 3 * H:4 * H]
    c_new = f_g * c + i_g * g_g
    h_new = o_g * jnp.tanh(c_new)
    return h_new, c_new


# ----------------------------------------------------------------------------
# Single-step kernel (matches the PyTorch module's forward exactly).
# ----------------------------------------------------------------------------
def _lstm_decoder_step_kernel(x_ref, h0_ref, c0_ref, w_gates_ref, b_gates_ref,
                              wlin_ref, blin_ref, out_ref):
    x = x_ref[...].astype(jnp.float32)
    h0 = h0_ref[...].astype(jnp.float32)
    c0 = c0_ref[...].astype(jnp.float32)
    B, I = x.shape
    H = h0.shape[-1]

    xh = jnp.concatenate([x, h0], axis=-1)                     # (B, I+H)
    h_new, c_new = _lstm_cell(xh, c0, w_gates_ref[...], b_gates_ref[...])
    y = jnp.dot(h_new, wlin_ref[...], preferred_element_type=jnp.float32) + blin_ref[...]

    # Pack [y | h | c | zero-pad] into one lane-dense slab -> single store.
    pad = out_ref.shape[-1] - (I + 2 * H)
    pieces = [y, h_new, c_new]
    if pad:
        pieces.append(jnp.zeros((B, pad), jnp.float32))
    out_ref[...] = jnp.concatenate(pieces, axis=-1).astype(out_ref.dtype)


# ----------------------------------------------------------------------------
# Autoregressive rollout kernel: T decode steps inside one kernel invocation.
# Weights are loaded into vregs once and reused every step; the model output is
# fed back as the next step's input (output size == input size).
# ----------------------------------------------------------------------------
def _lstm_decoder_rollout_kernel(x0_ref, h0_ref, c0_ref, w_gates_ref, b_gates_ref,
                                 wlin_ref, blin_ref, out_ref):
    B, I = x0_ref.shape
    H = h0_ref.shape[-1]
    T = out_ref.shape[0]
    lanes = out_ref.shape[-1]
    pad = lanes - (I + 2 * H)

    w_gates = w_gates_ref[...]
    w_lin = wlin_ref[...]
    # Hoisted broadcasts / constants (JAX doesn't CSE broadcast_in_dim across iters).
    b_gates = jnp.broadcast_to(b_gates_ref[...], (B, 4 * H))
    b_lin = jnp.broadcast_to(blin_ref[...], (B, I))
    zero_pad = jnp.zeros((B, pad), jnp.float32) if pad else None

    def step(t, carry):
        x, h, c = carry
        xh = jnp.concatenate([x, h], axis=-1)
        h_new, c_new = _lstm_cell(xh, c, w_gates, b_gates)
        y = jnp.dot(h_new, w_lin, preferred_element_type=jnp.float32) + b_lin
        pieces = [y, h_new, c_new]
        if zero_pad is not None:
            pieces.append(zero_pad)
        out_ref[t] = jnp.concatenate(pieces, axis=-1).astype(out_ref.dtype)
        return (y, h_new, c_new)                     # feed y back as the next input

    carry = (x0_ref[...].astype(jnp.float32),
             h0_ref[...].astype(jnp.float32),
             c0_ref[...].astype(jnp.float32))

    if T <= 16:
        # Fully unrolled: static per-step stores, full scheduler visibility.
        for t in range(T):
            carry = step(t, carry)
    else:
        jax.lax.fori_loop(0, T, step, carry)


# ----------------------------------------------------------------------------
# Wrappers
# ----------------------------------------------------------------------------
def lstm_decoder_forward(x_input, encoder_hidden_states, params):
    """Mirrors lstm_decoder.forward (single step).

    Returns (output (B, 1, I), (h (1, B, H), c (1, B, H))).
    """
    I = params["input_size"]
    H = params["hidden_size"]
    x = x_input.reshape(-1, 1, I)[:, 0, :]          # (B, I)  -- seq_len == 1
    h0, c0 = encoder_hidden_states
    B = x.shape[0]
    h0 = h0.reshape(B, H)
    c0 = c0.reshape(B, H)

    lanes = _round_up(max(I + 2 * H, 128), 128)
    vmem = pl.BlockSpec(memory_space=pltpu.MemorySpace.VMEM)

    packed = pl.pallas_call(
        _lstm_decoder_step_kernel,
        out_shape=jax.ShapeDtypeStruct((B, lanes), jnp.float32),
        in_specs=[vmem] * 7,
        out_specs=vmem,
    )(x, h0, c0,
      params["w_gates_t"],     # (I+H, 4H) = [W_ih^T ; W_hh^T]
      params["b_gates"],       # (1, 4H)   = b_ih + b_hh
      params["w_lin_t"],       # (H, I)
      params["b_lin"])         # (1, I)

    y = packed[:, :I]
    h_new = packed[:, I:I + H]
    c_new = packed[:, I + H:I + 2 * H]
    return y.reshape(B, 1, I), (h_new.reshape(1, B, H), c_new.reshape(1, B, H))


def lstm_decoder_rollout(x_input, encoder_hidden_states, params, num_steps):
    """Autoregressive decode: num_steps repeated forward() calls fused into one kernel.

    Returns (outputs (B, T, I), (h_T (1, B, H), c_T (1, B, H))).
    """
    I = params["input_size"]
    H = params["hidden_size"]
    x0 = x_input.reshape(-1, I)
    h0, c0 = encoder_hidden_states
    B = x0.shape[0]
    h0 = h0.reshape(B, H)
    c0 = c0.reshape(B, H)

    lanes = _round_up(max(I + 2 * H, 128), 128)
    vmem = pl.BlockSpec(memory_space=pltpu.MemorySpace.VMEM)

    packed = pl.pallas_call(
        _lstm_decoder_rollout_kernel,
        out_shape=jax.ShapeDtypeStruct((num_steps, B, lanes), jnp.float32),
        in_specs=[vmem] * 7,
        out_specs=vmem,
    )(x0, h0, c0, params["w_gates_t"], params["b_gates"],
      params["w_lin_t"], params["b_lin"])

    y_seq = jnp.transpose(packed[:, :, :I], (1, 0, 2))            # (B, T, I)
    h_T = packed[-1, :, I:I + H].reshape(1, B, H)
    c_T = packed[-1, :, I + H:I + 2 * H].reshape(1, B, H)
    return y_seq, (h_T, c_T)


# ----------------------------------------------------------------------------
# Params / pure-JAX references
# ----------------------------------------------------------------------------
def init_params(key, input_size=22, hidden_size=32):
    """Deterministic synthetic params matching nn.LSTM / nn.Linear shapes."""
    k = jax.random.split(key, 6)
    bound = 1.0 / jnp.sqrt(hidden_size)
    w_ih = jax.random.uniform(k[0], (4 * hidden_size, input_size),
                              minval=-bound, maxval=bound, dtype=jnp.float32)
    w_hh = jax.random.uniform(k[1], (4 * hidden_size, hidden_size),
                              minval=-bound, maxval=bound, dtype=jnp.float32)
    b_ih = jax.random.uniform(k[2], (4 * hidden_size,),
                              minval=-bound, maxval=bound, dtype=jnp.float32)
    b_hh = jax.random.uniform(k[3], (4 * hidden_size,),
                              minval=-bound, maxval=bound, dtype=jnp.float32)
    w_lin = jax.random.uniform(k[4], (input_size, hidden_size),
                               minval=-bound, maxval=bound, dtype=jnp.float32)
    b_lin = jax.random.uniform(k[5], (input_size,),
                               minval=-bound, maxval=bound, dtype=jnp.float32)
    return {
        "input_size": input_size,
        "hidden_size": hidden_size,
        # fused [W_ih^T ; W_hh^T]: (I+H, 4H)
        "w_gates_t": jnp.concatenate([w_ih.T, w_hh.T], axis=0),
        "b_gates": (b_ih + b_hh).reshape(1, 4 * hidden_size),
        "w_lin_t": w_lin.T,                                   # (H, I)
        "b_lin": b_lin.reshape(1, input_size),
    }


def _reference_step(x, h, c, params):
    H = params["hidden_size"]
    gates = jnp.concatenate([x, h], axis=-1) @ params["w_gates_t"] + params["b_gates"]
    i_g = jax.nn.sigmoid(gates[:, 0 * H:1 * H])
    f_g = jax.nn.sigmoid(gates[:, 1 * H:2 * H])
    g_g = jnp.tanh(gates[:, 2 * H:3 * H])
    o_g = jax.nn.sigmoid(gates[:, 3 * H:4 * H])
    c_new = f_g * c + i_g * g_g
    h_new = o_g * jnp.tanh(c_new)
    y = h_new @ params["w_lin_t"] + params["b_lin"]
    return y, h_new, c_new


def _reference_forward(x_input, encoder_hidden_states, params):
    I = params["input_size"]
    H = params["hidden_size"]
    x = x_input.reshape(-1, 1, I)[:, 0, :]
    h0, c0 = encoder_hidden_states
    B = x.shape[0]
    y, h, c = _reference_step(x, h0.reshape(B, H), c0.reshape(B, H), params)
    return y.reshape(B, 1, I), (h.reshape(1, B, H), c.reshape(1, B, H))


def _reference_rollout(x_input, encoder_hidden_states, params, num_steps):
    I = params["input_size"]
    H = params["hidden_size"]
    x = x_input.reshape(-1, I)
    h0, c0 = encoder_hidden_states
    B = x.shape[0]
    h, c = h0.reshape(B, H), c0.reshape(B, H)
    ys = []
    for _ in range(num_steps):
        y, h, c = _reference_step(x, h, c, params)
        ys.append(y)
        x = y
    return jnp.stack(ys, axis=1), (h.reshape(1, B, H), c.reshape(1, B, H))


if __name__ == "__main__":
    key = jax.random.PRNGKey(0)
    kp, kx, kh, kc = jax.random.split(key, 4)

    B, I, H, T = 2, 22, 32, 8     # input_size=22 is hard-coded in the module's .view
    params = init_params(kp, input_size=I, hidden_size=H)

    x_input = jax.random.normal(kx, (B, I), dtype=jnp.float32)
    h0 = jax.random.normal(kh, (1, B, H), dtype=jnp.float32)
    c0 = jax.random.normal(kc, (1, B, H), dtype=jnp.float32)

    # --- single-step forward (matches the PyTorch module's forward) ---
    out, (h1, c1) = lstm_decoder_forward(x_input, (h0, c0), params)
    jax.block_until_ready((out, h1, c1))
    ref_out, (ref_h, ref_c) = _reference_forward(x_input, (h0, c0), params)
    assert out.shape == (B, 1, I) and h1.shape == (1, B, H) and c1.shape == (1, B, H)
    assert jnp.allclose(out, ref_out, atol=1e-5), "output mismatch"
    assert jnp.allclose(h1, ref_h, atol=1e-5), "h mismatch"
    assert jnp.allclose(c1, ref_c, atol=1e-5), "c mismatch"

    # --- autoregressive rollout: time loop inside the kernel, weights VMEM-resident ---
    y_seq, (hT, cT) = lstm_decoder_rollout(x_input, (h0, c0), params, num_steps=T)
    jax.block_until_ready((y_seq, hT, cT))
    ref_y, (ref_hT, ref_cT) = _reference_rollout(x_input, (h0, c0), params, T)
    assert y_seq.shape == (B, T, I)
    assert jnp.allclose(y_seq, ref_y, atol=1e-4), "rollout output mismatch"
    assert jnp.allclose(hT, ref_hT, atol=1e-4), "rollout h mismatch"
    assert jnp.allclose(cT, ref_cT, atol=1e-4), "rollout c mismatch"

    print("KERNEL_OK")
</pallas_src>

<mosaic_0001>
module attributes {stable_mosaic.version = 11 : i64} {
  func.func @_lstm_decoder_step_kernel(%arg0: memref<2x22xf32, #tpu.memory_space<vmem>>, %arg1: memref<2x32xf32, #tpu.memory_space<vmem>>, %arg2: memref<2x32xf32, #tpu.memory_space<vmem>>, %arg3: memref<54x128xf32, #tpu.memory_space<vmem>>, %arg4: memref<1x128xf32, #tpu.memory_space<vmem>>, %arg5: memref<32x22xf32, #tpu.memory_space<vmem>>, %arg6: memref<1x22xf32, #tpu.memory_space<vmem>>, %arg7: memref<2x128xf32, #tpu.memory_space<vmem>>) attributes {dimension_semantics = [], scalar_prefetch = 0 : i64, scratch_operands = 0 : i64, tpu.core_type = #tpu.core_type<tc>} {
    %c0 = arith.constant 0 : index
    %c0_0 = arith.constant 0 : index
    %0 = vector.load %arg0[%c0, %c0_0] : memref<2x22xf32, #tpu.memory_space<vmem>>, vector<2x22xf32>
    %c0_1 = arith.constant 0 : index
    %c0_2 = arith.constant 0 : index
    %1 = vector.load %arg1[%c0_1, %c0_2] : memref<2x32xf32, #tpu.memory_space<vmem>>, vector<2x32xf32>
    %c0_3 = arith.constant 0 : index
    %c0_4 = arith.constant 0 : index
    %2 = vector.load %arg2[%c0_3, %c0_4] : memref<2x32xf32, #tpu.memory_space<vmem>>, vector<2x32xf32>
    %3 = tpu.concatenate %0, %1 in 1 : vector<2x22xf32>, vector<2x32xf32> -> vector<2x54xf32>
    %c0_5 = arith.constant 0 : index
    %c0_6 = arith.constant 0 : index
    %4 = vector.load %arg3[%c0_5, %c0_6] : memref<54x128xf32, #tpu.memory_space<vmem>>, vector<54x128xf32>
    %c0_7 = arith.constant 0 : index
    %c0_8 = arith.constant 0 : index
    %5 = vector.load %arg4[%c0_7, %c0_8] : memref<1x128xf32, #tpu.memory_space<vmem>>, vector<1x128xf32>
    %cst = arith.constant dense<0.000000e+00> : vector<2x128xf32>
    %6 = tpu.matmul %3, %4, %cst {dimension_numbers = #tpu.dot_dimension_numbers<[1], [0], [0], [1], [0, 0, 1, 1], [], []>} : vector<2x54xf32>, vector<54x128xf32>, vector<2x128xf32> -> vector<2x128xf32>
    %7 = vector.broadcast %5 : vector<1x128xf32> to vector<2x128xf32>
    %8 = arith.addf %6, %7 : vector<2x128xf32>
    %9 = arith.negf %8 : vector<2x128xf32>
    %10 = math.exp %9 : vector<2x128xf32>
    %cst_9 = arith.constant 1.000000e+00 : f32
    %11 = vector.broadcast %cst_9 : f32 to vector<2x128xf32>
    %12 = arith.addf %11, %10 : vector<2x128xf32>
    %13 = arith.divf %11, %12 : vector<2x128xf32>
    %14 = math.tanh %8 : vector<2x128xf32>
    %15 = vector.extract_strided_slice %13 {offsets = [0, 0], sizes = [2, 32], strides = [1, 1]} : vector<2x128xf32> to vector<2x32xf32>
    %16 = vector.extract_strided_slice %13 {offsets = [0, 32], sizes = [2, 32], strides = [1, 1]} : vector<2x128xf32> to vector<2x32xf32>
    %17 = vector.extract_strided_slice %14 {offsets = [0, 64], sizes = [2, 32], strides = [1, 1]} : vector<2x128xf32> to vector<2x32xf32>
    %18 = vector.extract_strided_slice %13 {offsets = [0, 96], sizes = [2, 32], strides = [1, 1]} : vector<2x128xf32> to vector<2x32xf32>
    %19 = arith.mulf %16, %2 : vector<2x32xf32>
    %20 = arith.mulf %15, %17 : vector<2x32xf32>
    %21 = arith.addf %19, %20 : vector<2x32xf32>
    %22 = math.tanh %21 : vector<2x32xf32>
    %23 = arith.mulf %18, %22 : vector<2x32xf32>
    %c0_10 = arith.constant 0 : index
    %c0_11 = arith.constant 0 : index
    %24 = vector.load %arg5[%c0_10, %c0_11] : memref<32x22xf32, #tpu.memory_space<vmem>>, vector<32x22xf32>
    %cst_12 = arith.constant dense<0.000000e+00> : vector<2x22xf32>
    %25 = tpu.matmul %23, %24, %cst_12 {dimension_numbers = #tpu.dot_dimension_numbers<[1], [0], [0], [1], [0, 0, 1, 1], [], []>} : vector<2x32xf32>, vector<32x22xf32>, vector<2x22xf32> -> vector<2x22xf32>
    %c0_13 = arith.constant 0 : index
    %c0_14 = arith.constant 0 : index
    %26 = vector.load %arg6[%c0_13, %c0_14] : memref<1x22xf32, #tpu.memory_space<vmem>>, vector<1x22xf32>
    %27 = vector.broadcast %26 : vector<1x22xf32> to vector<2x22xf32>
    %28 = arith.addf %25, %27 : vector<2x22xf32>
    %cst_15 = arith.constant 0.000000e+00 : f32
    %29 = vector.broadcast %cst_15 : f32 to vector<2x42xf32>
    %30 = tpu.concatenate %28, %23, %21, %29 in 1 : vector<2x22xf32>, vector<2x32xf32>, vector<2x32xf32>, vector<2x42xf32> -> vector<2x128xf32>
    %c0_16 = arith.constant 0 : index
    %c0_17 = arith.constant 0 : index
    %31 = vector.load %arg7[%c0_16, %c0_17] : memref<2x128xf32, #tpu.memory_space<vmem>>, vector<2x128xf32>
    tpu.vector_store %arg7[%c0_16, %c0_17], %30 {strides = array<i32>} : memref<2x128xf32, #tpu.memory_space<vmem>>, vector<2x128xf32>,
    return
  }
}

</mosaic_0001>

<bundles_post_ra>
// kernel: tpu_custom_call.1
= control target key start
LH: loop header
LB: loop body
LE: loop exit
PB: predicated region body
PF: predicated region fallthrough
CT: control target
= control target key end

     0   :  { %s371_s30 = smov 22   ;;  %v372_v3 = vmov 0.0|0.0   ;;  %vm373_vm0 = vmmov 0   ;;  %v374_v8 = vmov 0.0   ;;  %s375_s17 = smov 32   ;;  %s488_s0 = inlined_call_operand.vmem [shape: f32[2,22], index: 0, kind: input, shape index: {}]   ;;  %s489_s1 = inlined_call_operand.vmem [shape: f32[2,32], index: 1, kind: input, shape index: {}]   ;;  %s490_s2 = inlined_call_operand.vmem [shape: f32[2,32], index: 2, kind: input, shape index: {}]   ;;  %s491_s3 = inlined_call_operand.vmem [shape: f32[54,128], index: 3, kind: input, shape index: {}]   ;;  %s492_s4 = inlined_call_operand.vmem [shape: f32[1,128], index: 4, kind: input, shape index: {}]   ;;  %s493_s5 = inlined_call_operand.vmem [shape: f32[32,22], index: 5, kind: input, shape index: {}]   ;;  %s494_s6 = inlined_call_operand.vmem [shape: f32[1,22], index: 6, kind: input, shape index: {}]   ;;  %s495_s7 = inlined_call_operand.hbm [shape: f32[2,128], index: 7, kind: output, shape index: {}]  }
   0x1   :  { %v28_v0 = vld [vmem:[%s489_s1] sm:$0x3]  ;;  %v37_v2 = vld [vmem:[%s491_s3 + $0x8] sm:$0xff]  ;;  %316 = vmatprep.subr.bf16.mxu0 %v372_v3  ;;  %v38_v5 = vld [vmem:[%s491_s3 + $0x10] sm:$0xff]  ;;  %325 = vmatprep.subr.bf16.mxu1 %v372_v3 }
   0x2   :  { %v36_v1 = vld [vmem:[%s491_s3] sm:$0xff]  ;;  %31 = vrot.lane.b32.xlu0 %v28_v0, %s371_s30  ;;  %v39_v6 = vld [vmem:[%s491_s3 + $0x18] sm:$0xff]  ;;  %302 = vmatprep.mubr.msk.f32.mxu0 %vm373_vm0, %v374_v8  ;;  %v41_v11 = vld [vmem:[%s491_s3 + $0x28] sm:$0xff] }
   0x3   :  { %v317_v4 = vpack.c.bf16 %v37_v2, %v36_v1  ;;  %v320_v7 = vpack.c.bf16 %v39_v6, %v38_v5  ;;  %v29_v9 = vld [vmem:[%s490_s2] sm:$0x3] }
   0x4   :  { %v40_v10 = vld [vmem:[%s491_s3 + $0x20] sm:$0xff]  ;;  %136 = vrot.lane.b32.xlu1 %v29_v9, %s375_s17 }
   0x5   :  { %318 = vmatpush3.bf16.msra.mxu0 %v317_v4 }
   0x6   :  { %319 = vmatprep.subr.bf16.mxu0 %v372_v3 }
   0x7   :  { %12 = vsyncpa [#allocation3], 0  ;;  %313 = vmatprep.mubr.msk.f32.mxu1 %vm373_vm0, %v374_v8  ;;  %v323_v12 = vpack.c.bf16 %v41_v11, %v40_v10  ;;  %v42_v13 = vld [vmem:[%s491_s3 + $0x30] sm:$0x3f]  ;;  %vm54_vm1 = vcmask 1045504   ;;  %vm34_vm2 = vcmask 179200  }
   0x8   :  { %v27_v14 = vld [vmem:[%s488_s0] sm:$0x3]  ;;  %vm50_vm3 = vcmask 441344   ;;  %s376_s3 = smov 64   ;;  %v157_v33 = vld [vmem:[%s493_s5 + $0x8] sm:$0xff]  ;;  %v158_v34 = vld [vmem:[%s493_s5 + $0x10] sm:$0xff] }
   0x9   :  { %321 = vmatpush3.bf16.msra.mxu0 %v320_v7  ;;  %v269_v17 = vld [vmem:[%s492_s4] ss:$0 sm:$0xff]  ;;  %v159_v36 = vld [vmem:[%s493_s5 + $0x18] sm:$0xff]  ;;  %s377_s29 = smov 54   ;;  %vm170_vm4 = vcmask 261120   ;;  %vm252_vm5 = vcmask 703488  }
   0xa   :  { %322 = vmatprep.subr.bf16.mxu0 %v372_v3  ;;  %v156_v32 = vld [vmem:[%s493_s5] sm:$0xff]  ;;  %v329_v37 = vpack.c.bf16 %v159_v36, %v158_v34  ;;  %s378_s5 = smov [#allocation2]  }
   0xb   :  { %v326_v35 = vpack.c.bf16 %v157_v33, %v156_v32  ;;  %v273_v42 = vld [vmem:[%s494_s6] ss:$0 sm:$0xff]  ;;  %s261_s10 = sshll.u32 %s378_s5, 4  ;;  %s262_s10 = int_to_ptr.vmem [resolvable:$true] %s261_s10 }
   0xc   :  { %p352_p1 = scmp.lt.s32.totalorder %s262_s10, %s262_s10 }
   0xd   :  { %324 = vmatpush3.bf16.msra.mxu0 %v323_v12  ;;  %327 = vmatpush3.bf16.msra.mxu1 %v326_v35 }
   0xe   :  { %300 = vmatprep.subr.mxu0 %v374_v8  ;;  %328 = vmatprep.subr.bf16.mxu1 %v372_v3 }
  0x11   :  { %301 = vmatpush3.msk.msra.mxu0 %vm54_vm1, %v42_v13  ;;  %330 = vmatpush3.bf16.msra.mxu1 %v329_v37 }
  0x74   :  { %v32_v15 = vpop.permute.xlu0 %31 }
  0x75   :  { %v35_v16 = vsel %vm34_vm2, %v27_v14, %v32_v15 }
  0x76   :  { %303 = vmatmul.mubr.msk.f32.vlgmr.msra.gmra.mrb[0].mxu0 %vm50_vm3, %v35_v16  ;;  %v137_v28 = vpop.permute.xlu1 %136 }
 0x149   :  { %v124_v18 = vpop.f32.mrb[0].mxu0 }
 0x14a   :  { %v125_v19 = vadd.f32 %v269_v17, %v124_v18  ;;  %v304_v20 = vpop.f32.mrb[1].mxu0 }
 0x14c   :  { %339 = vtanh.f32 %v125_v19  ;;  %v272_v22 = vmul.f32 -1.442695, %v125_v19 }
 0x14e   :  { %341 = vpow2.f32 %v272_v22 }
 0x156   :  { %v340_v21 = vpop.eup %339 }
 0x157   :  { %141 = vrot.lane.b32.xlu0 %v340_v21, %s376_s3 }
 0x158   :  { %v342_v23 = vpop.eup %341 }
 0x159   :  { %v131_v24 = vadd.f32 1.0, %v342_v23 }
 0x15b   :  { %343 = vrcp.f32 %v131_v24 }
 0x165   :  { %v344_v25 = vpop.eup %343 }
 0x166   :  { %v139_v29 = vmul.f32 %v344_v25, %v137_v28 }
 0x1c9   :  { %v142_v26 = vpop.permute.xlu0 %141 }
 0x1ca   :  { %v144_v27 = vmul.f32 %v344_v25, %v142_v26 }
 0x1cc   :  { %146 = vrot.lane.b32.xlu1 %v144_v27, %s375_s17 }
 0x23e   :  { %v147_v30 = vpop.permute.xlu1 %146 }
 0x23f   :  { %v149_v31 = vadd.f32 %v147_v30, %v139_v29 }
 0x241   :  { %345 = vtanh.f32 %v149_v31 }
 0x24b   :  { %v346_v38 = vpop.eup %345 }
 0x24c   :  { %152 = vrot.lane.b32.xlu0 %v346_v38, %s376_s3 }
 0x2be   :  { %v153_v39 = vpop.permute.xlu0 %152 }
 0x2bf   :  { %v155_v40 = vmul.f32 %v344_v25, %v153_v39 }
 0x2c1   :  { %243 = vrot.lane.b32.xlu0 %v155_v40, %s377_s29  ;;  %168 = vrot.lane.b32.xlu1 %v155_v40, %s375_s17 }
 0x2c5   :  { %247 = vrot.lane.b32.xlu1 %v149_v31, %s371_s30  ;;  %s347_s30 = scalar_lea.vmem %s262_s10, 32 }
 0x2c6   :  { %p348_p0 = scmp.ne.s32.totalorder %s262_s10, %s347_s30  ;;  %p353_p2 = scmp.lt.s32.totalorder %s347_s30, %s347_s30 }
 0x2c8   :  { %p354_p3 = por %p353_p2, %p352_p1 }
 0x2ca   :  { %p355_p4 = pnand %p354_p3, %p348_p0 }
 0x333   :  { %v169_v41 = vpop.permute.xlu1 %168  ;;  %v244_v46 = vpop.permute.xlu0 %243 }
 0x334   :  { %314 = vmatmul.mubr.msk.f32.vlgmr.msra.gmra.mrb[0].mxu1 %vm170_vm4, %v169_v41 }
 0x337   :  { %v248_v47 = vpop.permute.xlu1 %247 }
 0x407   :  { %v239_v43 = vpop.f32.mrb[0].mxu1 }
 0x408   :  { %v240_v44 = vadd.f32 %v273_v42, %v239_v43  ;;  %v315_v45 = vpop.f32.mrb[1].mxu1 }
 0x40a   :  { %v250_v48 = vsel %vm34_vm2, %v240_v44, %v244_v46 }
 0x40b   :  { %v251_v49 = vsel %vm50_vm3, %v250_v48, %v248_v47 }
 0x40c   :  { %v253_v50 = vsel %vm252_vm5, %v251_v49, 0.0 }
 0x40d   :  { %254 = vst [vmem:[#allocation2] sm:$0x3] %v253_v50 }
 0x40e   :  { %358 = shalt.err (!%p355_p4)
}
 0x40f   :  { %s359_s11 = scalar_lea.hbm %s495_s7, 32 }
 0x410   :  { %p360_p5 = scmp.ne.s32.totalorder %s495_s7, %s359_s11  ;;  %p363_p6 = scmp.lt.u32.totalorder %s359_s11, %s495_s7 }
 0x412   :  { %p365_p7 = pnand %p363_p6, %p360_p5 }
 0x414   :  { %368 = shalt.err (!%p365_p7)
}
 0x415   :  { %264 = dma.vmem_to_hbm [thread:$0]  %s262_s10, 32, %s495_s7, [#allocation3]  }
 0x416   :  { %369 = dma.done.wait [#allocation3], 32  }
 0x417   :  { %370 = vsyncadd [#allocation3], 4294967264 }
 0x418   :  { %268 = vsyncpa [#allocation3], 1 }

</bundles_post_ra>
